<compile_context>
chip_gen: v5e
topology: v5e:2x2
jax: 0.10.0
libtpu: 0.0.40
codegen_flags: <defaults>
</compile_context>

<pallas_src>
import functools

import jax
import jax.numpy as jnp
from jax.experimental import pallas as pl
from jax.experimental.pallas import tpu as pltpu


def _pick_tile(n, target):
    """Largest tile <= target that divides n and is a multiple of 8 (else full n)."""
    if n <= target:
        return n
    for t in range(target, 7, -1):
        if n % t == 0 and t % 8 == 0:
            return t
    return n


# --------------------------------------------------------------------------- #
# Kernel 1: QKV projection into head-major (B, H, N, dh) q / k / v.
# --------------------------------------------------------------------------- #
def _qkv_proj_kernel(x_ref, w_ref, q_ref, k_ref, v_ref, *, mxu_dtype):
    # x_ref   : (1, tn, D)        activations
    # w_ref   : (3, 1, D, dh)     head-major [Wq*scale | Wk | Wv] for this head
    # outputs : (1, 1, tn, dh)    q / k / v tiles, stored in mxu_dtype
    x2d = x_ref[0].astype(mxu_dtype)                     # (tn, D)
    for s, o_ref in enumerate((q_ref, k_ref, v_ref)):
        o_ref[0, 0] = jnp.dot(
            x2d, w_ref[s, 0], preferred_element_type=jnp.float32
        ).astype(o_ref.dtype)


# --------------------------------------------------------------------------- #
# Kernel 2: flash attention (online softmax) + fused output projection.
# Grid: (B, q_tiles, heads, kv_tiles); heads & kv are reduction ("arbitrary").
# --------------------------------------------------------------------------- #
def _flash_attn_proj_kernel(q_ref, k_ref, v_ref, wout_ref, bout_ref, o_ref,
                            m_ref, l_ref, acc_ref, y_ref,
                            *, mxu_dtype, approx_reciprocal):
    h = pl.program_id(2)
    ki = pl.program_id(3)
    nh = pl.num_programs(2)
    nk = pl.num_programs(3)

    # Output-projection accumulator: init once per (b, q_tile).
    @pl.when(jnp.logical_and(h == 0, ki == 0))
    def _():
        y_ref[...] = jnp.zeros_like(y_ref)

    # Online-softmax state: init once per (b, q_tile, head).
    @pl.when(ki == 0)
    def _():
        m_ref[...] = jnp.full_like(m_ref, -jnp.inf)
        l_ref[...] = jnp.zeros_like(l_ref)
        acc_ref[...] = jnp.zeros_like(acc_ref)

    q = q_ref[0, 0]                                      # (tq, dh)  pre-scaled, mxu_dtype
    k = k_ref[0, 0]                                      # (tk, dh)
    v = v_ref[0, 0]                                      # (tk, dh)

    # Scores: contract dh directly (no k transpose), f32 accumulation on the MXU.
    s = jax.lax.dot_general(q, k, (((1,), (1,)), ((), ())),
                            preferred_element_type=jnp.float32)      # (tq, tk)

    # Online softmax — all elementwise math in f32 (v5e has no bf16 VPU/EUP).
    m_prev = m_ref[...]                                               # (tq, 1)
    m_new = jnp.maximum(m_prev, jnp.max(s, axis=-1, keepdims=True))
    alpha = jnp.exp(m_prev - m_new)
    p = jnp.exp(s - m_new)                                            # (tq, tk) f32
    l_ref[...] = alpha * l_ref[...] + jnp.sum(p, axis=-1, keepdims=True)
    acc_ref[...] = alpha * acc_ref[...] + jax.lax.dot_general(
        p.astype(mxu_dtype), v, (((1,), (0,)), ((), ())),
        preferred_element_type=jnp.float32)                           # (tq, dh)
    m_ref[...] = m_new

    # Finalize this head: normalize and fold straight into the (tq, D) projection
    # accumulator — the per-head output never touches HBM and heads are never
    # re-concatenated along lanes.
    @pl.when(ki == nk - 1)
    def _():
        out_h = acc_ref[...] * pl.reciprocal(l_ref[...], approx=approx_reciprocal)
        y_ref[...] += jnp.dot(out_h.astype(mxu_dtype), wout_ref[0],
                              preferred_element_type=jnp.float32)     # (tq, D)

    # Last head, last kv tile: add bias and do one lane-dense (tq, D) store.
    @pl.when(jnp.logical_and(ki == nk - 1, h == nh - 1))
    def _():
        o_ref[0] = (y_ref[...] + bout_ref[...]).astype(o_ref.dtype)


# --------------------------------------------------------------------------- #
# Host wrapper.
# --------------------------------------------------------------------------- #
def attention_forward(x, w_qkv, w_out, b_out, *, num_heads, dim_head,
                      mxu_dtype=jnp.bfloat16, q_tile=256, kv_tile=512,
                      n_tile=256, approx_reciprocal=None, vmem_limit_bytes=None):
    """x: (B, N, D) float32 -> (B, N, D) float32. Eval-mode forward (no dropout)."""
    B, N, D = x.shape
    assert D == num_heads * dim_head
    scale = dim_head ** (-0.5)
    if approx_reciprocal is None:
        approx_reciprocal = (mxu_dtype != jnp.float32)

    tn = _pick_tile(N, n_tile)
    tq = _pick_tile(N, q_tile)
    tk = _pick_tile(N, kv_tile)

    # One-time host-side weight re-layouts (tiny):
    #  * w_hm:  (3, H, D, dh) head-major QKV weight; softmax scale folded into W_q,
    #    so neither scores nor q are scaled inside the kernel.
    #  * w_out_hm: (H, dh, D) head-major output projection (single copy, no tiling).
    #  * b_out as (1, D) for a clean (8,128)-layout broadcast.
    w_hm = w_qkv.reshape(D, 3, num_heads, dim_head).transpose(1, 2, 0, 3)
    w_hm = w_hm * jnp.array([scale, 1.0, 1.0], w_hm.dtype).reshape(3, 1, 1, 1)
    w_hm = w_hm.astype(mxu_dtype)
    w_out_hm = w_out.reshape(num_heads, dim_head, D).astype(mxu_dtype)
    b_out2d = b_out.reshape(1, D).astype(jnp.float32)

    # ---- Kernel 1: QKV projection (head-major outputs, stored in mxu_dtype). ----
    qkv_sd = jax.ShapeDtypeStruct((B, num_heads, N, dim_head), mxu_dtype)
    qkv_out_spec = pl.BlockSpec((1, 1, tn, dim_head),
                                lambda b, ni, h: (b, h, ni, 0))
    q_hm, k_hm, v_hm = pl.pallas_call(
        functools.partial(_qkv_proj_kernel, mxu_dtype=mxu_dtype),
        out_shape=(qkv_sd, qkv_sd, qkv_sd),
        grid_spec=pltpu.PrefetchScalarGridSpec(
            num_scalar_prefetch=0,
            grid=(B, N // tn, num_heads),
            in_specs=[
                pl.BlockSpec((1, tn, D), lambda b, ni, h: (b, ni, 0)),           # x
                pl.BlockSpec((3, 1, D, dim_head), lambda b, ni, h: (0, h, 0, 0)),  # W
            ],
            out_specs=(qkv_out_spec, qkv_out_spec, qkv_out_spec),
        ),
        compiler_params=pltpu.CompilerParams(
            dimension_semantics=("parallel", "parallel", "parallel"),
            vmem_limit_bytes=vmem_limit_bytes),
    )(x, w_hm)

    # ---- Kernel 2: flash attention + fused output projection. ----
    out = pl.pallas_call(
        functools.partial(_flash_attn_proj_kernel, mxu_dtype=mxu_dtype,
                          approx_reciprocal=approx_reciprocal),
        out_shape=jax.ShapeDtypeStruct((B, N, D), x.dtype),
        grid_spec=pltpu.PrefetchScalarGridSpec(
            num_scalar_prefetch=0,
            grid=(B, N // tq, num_heads, N // tk),
            in_specs=[
                pl.BlockSpec((1, 1, tq, dim_head),
                             lambda b, qi, h, ki: (b, h, qi, 0)),     # q
                pl.BlockSpec((1, 1, tk, dim_head),
                             lambda b, qi, h, ki: (b, h, ki, 0)),     # k
                pl.BlockSpec((1, 1, tk, dim_head),
                             lambda b, qi, h, ki: (b, h, ki, 0)),     # v
                pl.BlockSpec((1, dim_head, D),
                             lambda b, qi, h, ki: (h, 0, 0)),         # W_out (head h)
                pl.BlockSpec((1, D), lambda b, qi, h, ki: (0, 0)),    # b_out
            ],
            out_specs=pl.BlockSpec((1, tq, D), lambda b, qi, h, ki: (b, qi, 0)),
            scratch_shapes=[
                pltpu.VMEM((tq, 1), jnp.float32),          # running max
                pltpu.VMEM((tq, 1), jnp.float32),          # running sum
                pltpu.VMEM((tq, dim_head), jnp.float32),   # per-head accumulator
                pltpu.VMEM((tq, D), jnp.float32),          # projected-output accumulator
            ],
        ),
        compiler_params=pltpu.CompilerParams(
            dimension_semantics=("parallel", "parallel", "arbitrary", "arbitrary"),
            vmem_limit_bytes=vmem_limit_bytes),
    )(q_hm, k_hm, v_hm, w_out_hm, b_out2d)
    return out


def attention_reference(x, w_qkv, w_out, b_out, *, num_heads, dim_head):
    """Pure-JAX reference mirroring the PyTorch forward (eval mode)."""
    B, N, D = x.shape
    scale = dim_head ** (-0.5)
    qkv = x @ w_qkv
    q, k, v = jnp.split(qkv, 3, axis=-1)

    def to_heads(t):  # 'b n (h d) -> b h n d'
        return t.reshape(B, N, num_heads, dim_head).transpose(0, 2, 1, 3)

    q, k, v = map(to_heads, (q, k, v))
    dots = jnp.einsum('bhnd,bhmd->bhnm', q, k) * scale
    attn = jax.nn.softmax(dots, axis=-1)
    out = jnp.einsum('bhnm,bhmd->bhnd', attn, v)
    out = out.transpose(0, 2, 1, 3).reshape(B, N, D)
    return out @ w_out + b_out


if __name__ == "__main__":
    # Small config consistent with the module:
    #   hidden_dim = 32, num_heads = 4, dim_head = 8  -> inner_dim == hidden_dim
    #   project_out = True; Dropout is an eval-mode no-op.
    B, N, D = 2, 8, 32
    num_heads, dim_head = 4, 8

    key = jax.random.PRNGKey(0)
    kx, kqkv, kwo, kbo = jax.random.split(key, 4)

    x = jax.random.normal(kx, (B, N, D), dtype=jnp.float32)
    w_qkv = jax.random.normal(kqkv, (D, 3 * D), dtype=jnp.float32) * (D ** -0.5)
    w_out = jax.random.normal(kwo, (D, D), dtype=jnp.float32) * (D ** -0.5)
    b_out = jax.random.normal(kbo, (D,), dtype=jnp.float32) * 0.02

    y_ref = attention_reference(x, w_qkv, w_out, b_out,
                                num_heads=num_heads, dim_head=dim_head)

    # Exact f32 path (tight correctness check; exact reciprocal).
    y_f32 = attention_forward(x, w_qkv, w_out, b_out,
                              num_heads=num_heads, dim_head=dim_head,
                              mxu_dtype=jnp.float32)
    y_f32 = jax.block_until_ready(y_f32)
    assert y_f32.shape == (B, N, D)
    assert jnp.allclose(y_f32, y_ref, atol=1e-4, rtol=1e-4)

    # Production path: bf16 MXU inputs, f32 softmax, approx reciprocal.
    y_bf16 = attention_forward(x, w_qkv, w_out, b_out,
                               num_heads=num_heads, dim_head=dim_head)
    y_bf16 = jax.block_until_ready(y_bf16)
    assert y_bf16.shape == (B, N, D)
    assert jnp.allclose(y_bf16, y_ref, atol=5e-2, rtol=5e-2)

    print("KERNEL_OK")
</pallas_src>

<mosaic_0001>
module attributes {stable_mosaic.version = 11 : i64} {
  func.func @_qkv_proj_kernel(%arg0: i32, %arg1: i32, %arg2: i32, %arg3: memref<1x8x32xf32, #tpu.memory_space<vmem>>, %arg4: memref<3x1x32x8xf32, #tpu.memory_space<vmem>>, %arg5: memref<1x1x8x8xf32, #tpu.memory_space<vmem>>, %arg6: memref<1x1x8x8xf32, #tpu.memory_space<vmem>>, %arg7: memref<1x1x8x8xf32, #tpu.memory_space<vmem>>) attributes {dimension_semantics = [#tpu.dimension_semantics<parallel>, #tpu.dimension_semantics<parallel>, #tpu.dimension_semantics<parallel>], iteration_bounds = array<i64: 2, 1, 4>, scalar_prefetch = 0 : i64, scratch_operands = 0 : i64, tpu.core_type = #tpu.core_type<tc>, window_params = [{transform_indices = @transform_0, window_bounds = array<i64: 1, 8, 32>}, {transform_indices = @transform_1, window_bounds = array<i64: 3, 1, 32, 8>}, {transform_indices = @transform_2, window_bounds = array<i64: 1, 1, 8, 8>}, {transform_indices = @transform_3, window_bounds = array<i64: 1, 1, 8, 8>}, {transform_indices = @transform_4, window_bounds = array<i64: 1, 1, 8, 8>}]} {
    %c0 = arith.constant 0 : index
    %c0_0 = arith.constant 0 : index
    %c0_1 = arith.constant 0 : index
    %0 = vector.load %arg3[%c0, %c0_0, %c0_1] : memref<1x8x32xf32, #tpu.memory_space<vmem>>, vector<1x8x32xf32>
    %1 = vector.shape_cast %0 : vector<1x8x32xf32> to vector<8x32xf32>
    %c0_2 = arith.constant 0 : index
    %c0_3 = arith.constant 0 : index
    %c0_4 = arith.constant 0 : index
    %c0_5 = arith.constant 0 : index
    %2 = vector.load %arg4[%c0_2, %c0_3, %c0_4, %c0_5] : memref<3x1x32x8xf32, #tpu.memory_space<vmem>>, vector<1x1x32x8xf32>
    %3 = vector.shape_cast %2 : vector<1x1x32x8xf32> to vector<32x8xf32>
    %cst = arith.constant dense<0.000000e+00> : vector<8x8xf32>
    %4 = tpu.matmul %1, %3, %cst {dimension_numbers = #tpu.dot_dimension_numbers<[1], [0], [0], [1], [0, 0, 1, 1], [], []>} : vector<8x32xf32>, vector<32x8xf32>, vector<8x8xf32> -> vector<8x8xf32>
    %c0_6 = arith.constant 0 : index
    %c0_7 = arith.constant 0 : index
    %c0_8 = arith.constant 0 : index
    %c0_9 = arith.constant 0 : index
    %5 = vector.load %arg5[%c0_6, %c0_7, %c0_8, %c0_9] : memref<1x1x8x8xf32, #tpu.memory_space<vmem>>, vector<1x1x8x8xf32>
    %6 = vector.shape_cast %5 : vector<1x1x8x8xf32> to vector<8x8xf32>
    %7 = vector.shape_cast %4 : vector<8x8xf32> to vector<1x1x8x8xf32>
    tpu.vector_store %arg5[%c0_6, %c0_7, %c0_8, %c0_9], %7 {strides = array<i32>} : memref<1x1x8x8xf32, #tpu.memory_space<vmem>>, vector<1x1x8x8xf32>,
    %c1 = arith.constant 1 : index
    %c0_10 = arith.constant 0 : index
    %c0_11 = arith.constant 0 : index
    %c0_12 = arith.constant 0 : index
    %8 = vector.load %arg4[%c1, %c0_10, %c0_11, %c0_12] : memref<3x1x32x8xf32, #tpu.memory_space<vmem>>, vector<1x1x32x8xf32>
    %9 = vector.shape_cast %8 : vector<1x1x32x8xf32> to vector<32x8xf32>
    %cst_13 = arith.constant dense<0.000000e+00> : vector<8x8xf32>
    %10 = tpu.matmul %1, %9, %cst_13 {dimension_numbers = #tpu.dot_dimension_numbers<[1], [0], [0], [1], [0, 0, 1, 1], [], []>} : vector<8x32xf32>, vector<32x8xf32>, vector<8x8xf32> -> vector<8x8xf32>
    %c0_14 = arith.constant 0 : index
    %c0_15 = arith.constant 0 : index
    %c0_16 = arith.constant 0 : index
    %c0_17 = arith.constant 0 : index
    %11 = vector.load %arg6[%c0_14, %c0_15, %c0_16, %c0_17] : memref<1x1x8x8xf32, #tpu.memory_space<vmem>>, vector<1x1x8x8xf32>
    %12 = vector.shape_cast %11 : vector<1x1x8x8xf32> to vector<8x8xf32>
    %13 = vector.shape_cast %10 : vector<8x8xf32> to vector<1x1x8x8xf32>
    tpu.vector_store %arg6[%c0_14, %c0_15, %c0_16, %c0_17], %13 {strides = array<i32>} : memref<1x1x8x8xf32, #tpu.memory_space<vmem>>, vector<1x1x8x8xf32>,
    %c2 = arith.constant 2 : index
    %c0_18 = arith.constant 0 : index
    %c0_19 = arith.constant 0 : index
    %c0_20 = arith.constant 0 : index
    %14 = vector.load %arg4[%c2, %c0_18, %c0_19, %c0_20] : memref<3x1x32x8xf32, #tpu.memory_space<vmem>>, vector<1x1x32x8xf32>
    %15 = vector.shape_cast %14 : vector<1x1x32x8xf32> to vector<32x8xf32>
    %cst_21 = arith.constant dense<0.000000e+00> : vector<8x8xf32>
    %16 = tpu.matmul %1, %15, %cst_21 {dimension_numbers = #tpu.dot_dimension_numbers<[1], [0], [0], [1], [0, 0, 1, 1], [], []>} : vector<8x32xf32>, vector<32x8xf32>, vector<8x8xf32> -> vector<8x8xf32>
    %c0_22 = arith.constant 0 : index
    %c0_23 = arith.constant 0 : index
    %c0_24 = arith.constant 0 : index
    %c0_25 = arith.constant 0 : index
    %17 = vector.load %arg7[%c0_22, %c0_23, %c0_24, %c0_25] : memref<1x1x8x8xf32, #tpu.memory_space<vmem>>, vector<1x1x8x8xf32>
    %18 = vector.shape_cast %17 : vector<1x1x8x8xf32> to vector<8x8xf32>
    %19 = vector.shape_cast %16 : vector<8x8xf32> to vector<1x1x8x8xf32>
    tpu.vector_store %arg7[%c0_22, %c0_23, %c0_24, %c0_25], %19 {strides = array<i32>} : memref<1x1x8x8xf32, #tpu.memory_space<vmem>>, vector<1x1x8x8xf32>,
    return
  }
  func.func @transform_0(%arg0: i32, %arg1: i32, %arg2: i32) -> (i32, i32, i32) {
    %c0_i32 = arith.constant 0 : i32
    %c0_i32_0 = arith.constant 0 : i32
    return %arg0, %arg1, %c0_i32 : i32, i32, i32
  }
  func.func @transform_1(%arg0: i32, %arg1: i32, %arg2: i32) -> (i32, i32, i32, i32) {
    %c0_i32 = arith.constant 0 : i32
    %c0_i32_0 = arith.constant 0 : i32
    %c0_i32_1 = arith.constant 0 : i32
    %c0_i32_2 = arith.constant 0 : i32
    return %c0_i32, %arg2, %c0_i32_0, %c0_i32_1 : i32, i32, i32, i32
  }
  func.func @transform_2(%arg0: i32, %arg1: i32, %arg2: i32) -> (i32, i32, i32, i32) {
    %c0_i32 = arith.constant 0 : i32
    %c0_i32_0 = arith.constant 0 : i32
    return %arg0, %arg2, %arg1, %c0_i32 : i32, i32, i32, i32
  }
  func.func @transform_3(%arg0: i32, %arg1: i32, %arg2: i32) -> (i32, i32, i32, i32) {
    %c0_i32 = arith.constant 0 : i32
    %c0_i32_0 = arith.constant 0 : i32
    return %arg0, %arg2, %arg1, %c0_i32 : i32, i32, i32, i32
  }
  func.func @transform_4(%arg0: i32, %arg1: i32, %arg2: i32) -> (i32, i32, i32, i32) {
    %c0_i32 = arith.constant 0 : i32
    %c0_i32_0 = arith.constant 0 : i32
    return %arg0, %arg2, %arg1, %c0_i32 : i32, i32, i32, i32
  }
}

</mosaic_0001>

<bundles_post_ra>
// kernel: tpu_custom_call.1
= control target key start
LH: loop header
LB: loop body
LE: loop exit
PB: predicated region body
PF: predicated region fallthrough
CT: control target
= control target key end

     0   :  { %s1232_s0 = inlined_call_operand.vmem [shape: f32[2,8,32], index: 0, kind: input, shape index: {}]   ;;  %s1233_s1 = inlined_call_operand.vmem [shape: f32[3,4,32,8], index: 1, kind: input, shape index: {}]   ;;  %s1234_s2 = inlined_call_operand.hbm [shape: f32[2,4,8,8], index: 2, kind: output, shape index: {0}]   ;;  %s1235_s3 = inlined_call_operand.hbm [shape: f32[2,4,8,8], index: 3, kind: output, shape index: {1}]   ;;  %s1236_s4 = inlined_call_operand.hbm [shape: f32[2,4,8,8], index: 4, kind: output, shape index: {2}]  }
   0x1   :  { %1246 = sst [smem:[#allocation15_spill]] %s1232_s0 }
   0x2   :  { %1247 = sst [smem:[#allocation16_spill]] %s1233_s1 }
   0x3   :  { %10 = vsyncpa [#allocation4], 0 }
   0x4   :  { %12 = vsyncpa [#allocation4 + $0x1], 0 }
   0x5   :  { %13 = vsyncpa [#allocation6], 0 }
   0x6   :  { %15 = vsyncpa [#allocation6 + $0x1], 0  ;;  %s995_s15 = smov 0   ;;  %s997_s16 = smov 0  }
   0x7   :  { %s999_s17 = smov 0   ;;  %s1001_s18 = smov 0  }
   0x8   :  { %s1003_s19 = smov 0   ;;  %s1005_s20 = smov 0  }
   0x9   :  { %s1007_s21 = smov 0   ;;  %s1009_s22 = smov 0  }
   0xa   :  { %s1011_s23 = smov 0   ;;  %s1013_s24 = smov 0  }
   0xb LB: > { %1248 = sst [smem:[#allocation10_spill]] %s964_s23  ;;  %s665_s25 = sadd.s32 4294967295, %s968_s24   ;;  %s968_s24 = sphi %s1013_s24, %s21_s24   ;;  %s964_s23 = sphi %s1011_s23, %s1268_s23   ;;  %s960_s22 = sphi %s1009_s22, %s1275_s22   ;;  %s956_s21 = sphi %s1007_s21, %s1266_s21   ;;  %s952_s20 = sphi %s1005_s20, %s1274_s20   ;;  %s948_s19 = sphi %s1003_s19, %s1273_s19   ;;  %s944_s18 = sphi %s1001_s18, %s1272_s18   ;;  %s940_s17 = sphi %s999_s17, %s1271_s17   ;;  %s936_s16 = sphi %s997_s16, %s1270_s16   ;;  %s932_s15 = sphi %s995_s15, %s1269_s15  }
   0xc   : > { %s1237_s26 = sadd.s32 4294967294, %s968_s24   ;;  %s33_s27 = sadd.s32 1, %s960_s22 }
   0xd   : > { %s40_s28 = sadd.s32 1, %s964_s23  ;;  %p34_p0 = scmp.ge.s32.totalorder %s33_s27, 4 }
   0xe   : > { %s75_s29 = sadd.s32 1, %s948_s19  ;;  %p82_p1 = scmp.ne.s32.totalorder %s948_s19, %s944_s18 }
   0xf   : > { %p83_p2 = scmp.eq.s32.totalorder %s968_s24, 0  ;;  %s1277_s27 = smov (%p34_p0, %s33_s27), 0 }
  0x10   : > { %1249 = sst [smem:[#allocation11_spill]] %s1277_s27  ;;  %s1279_s28 = smov (!%p34_p0, %s40_s28), %s964_s23 }
  0x11   : > { %s72_s30 = ssub.s32 %s960_s22, %s1277_s27  ;;  %p1058_p3 = por %p83_p2, %p82_p1 }
  0x12   : > { %p42_p4 = scmp.ge.s32.totalorder %s1279_s28, 2  ;;  %p73_p5 = scmp.eq.s32.totalorder %s72_s30, 0 }
  0x13   : > { %s105_s6 = sadd.s32 1, %s940_s17  ;;  %p115_p6 = scmp.ne.s32.totalorder %s940_s17, %s936_s16 }
  0x14   : > { %s1281_s28 = smov (%p42_p4, %s1279_s28), 0  ;;  %p116_p7 = scmp.eq.s32.totalorder %s665_s25, 7 }
  0x15   : > { %1251 = sst [smem:[#allocation12_spill]] %s1281_s28  ;;  %s98_s8 = ssub.s32 %s964_s23, %s1281_s28 }
  0x16   : > { %s1068_s7 = scalar_select %p73_p5, %s948_s19, %s75_s29  }
  0x17   : > { %s100_s9 = sor.u32 %s98_s8, %s72_s30  ;;  %p121_p8 = scmp.ne.s32.totalorder %s936_s16, %s932_s15 }
  0x18   : > { %p103_p9 = scmp.eq.s32.totalorder %s100_s9, 0  ;;  %p1076_p10 = por %p116_p7, %p115_p6 }
  0x19   : > { %p122_p11 = scmp.eq.s32.totalorder %s1237_s26, 7  ;;  %p668_p13 = scmp.ge.s32.totalorder %s968_s24, 8 }
  0x1a   : > { %s1083_s11 = scalar_select %p103_p9, %s940_s17, %s105_s6  }
  0x1b   : > { %p1085_p12 = por %p122_p11, %p121_p8  ;;  %198 = sbr.rel (%p668_p13) target bundleno = 54 (0x36), region = 16 }
  0x20   : > { %211 = sbr.rel (!%p1058_p3) target bundleno = 54 (0x36), region = 24  ;;  %s213_s13 = sand.u32 (%p1058_p3), 1, %s948_s19  }
  0x21   : > { %s698_s14 = sshll.u32 (%p1058_p3), %s960_s22, 5  ;;  %s699_s29 = smul.u32 (%p1058_p3), 96, %s213_s13 }
  0x22   : > { %s1254_s1 = sld [smem:[#allocation16_spill]] (%p1058_p3) }
  0x23   : > { %s215_s9 = scalar_lea.vmem (%p1058_p3), [#allocation2], %s699_s29 }
  0x28   : > { %s218_s6 = scalar_lea.vmem %s1254_s1, %s698_s14 }
  0x29   : > { %v269_v0 = vld [vmem:[%s218_s6] sm:$0xff]  ;;  %v271_v1 = vld [vmem:[%s218_s6 + $0x8] sm:$0xff]  ;;  %v273_v2 = vld [vmem:[%s218_s6 + $0x10] sm:$0xff] }
  0x2a   : > { %270 = vst [vmem:[%s215_s9] sm:$0xff] %v269_v0  ;;  %v275_v3 = vld [vmem:[%s218_s6 + $0x18] sm:$0xff]  ;;  %v277_v4 = vld [vmem:[%s218_s6 + $0x80] sm:$0xff]  ;;  %v279_v5 = vld [vmem:[%s218_s6 + $0x88] sm:$0xff] }
  0x2b   : > { %272 = vst [vmem:[%s215_s9 + $0x8] sm:$0xff] %v271_v1  ;;  %v281_v6 = vld [vmem:[%s218_s6 + $0x90] sm:$0xff]  ;;  %v283_v7 = vld [vmem:[%s218_s6 + $0x98] sm:$0xff]  ;;  %v285_v8 = vld [vmem:[%s218_s6 + $0x100] sm:$0xff] }
  0x2c   : > { %274 = vst [vmem:[%s215_s9 + $0x10] sm:$0xff] %v273_v2  ;;  %v287_v9 = vld [vmem:[%s218_s6 + $0x108] sm:$0xff]  ;;  %v289_v10 = vld [vmem:[%s218_s6 + $0x110] sm:$0xff]  ;;  %v291_v11 = vld [vmem:[%s218_s6 + $0x118] sm:$0xff] }
  0x2d   : > { %276 = vst [vmem:[%s215_s9 + $0x18] sm:$0xff] %v275_v3 }
  0x2e   : > { %278 = vst [vmem:[%s215_s9 + $0x20] sm:$0xff] %v277_v4 }
  0x2f   : > { %280 = vst [vmem:[%s215_s9 + $0x28] sm:$0xff] %v279_v5 }
  0x30   : > { %282 = vst [vmem:[%s215_s9 + $0x30] sm:$0xff] %v281_v6 }
  0x31   : > { %284 = vst [vmem:[%s215_s9 + $0x38] sm:$0xff] %v283_v7 }
  0x32   : > { %286 = vst [vmem:[%s215_s9 + $0x40] sm:$0xff] %v285_v8 }
  0x33   : > { %288 = vst [vmem:[%s215_s9 + $0x48] sm:$0xff] %v287_v9 }
  0x34   : > { %290 = vst [vmem:[%s215_s9 + $0x50] sm:$0xff] %v289_v10 }
  0x35   : > { %292 = vst [vmem:[%s215_s9 + $0x58] sm:$0xff] %v291_v11 }
  0x36 PF: > { %p671_p0 = scmp.ge.s32.totalorder %s968_s24, 1  ;;  %p297_p1 = scmp.lt.s32.totalorder %s968_s24, 9 }
  0x38   : > { %p298_p2 = pnand %p671_p0, %p297_p1 }
  0x3a   : > { %301 = sbr.rel (%p298_p2) target bundleno = 242 (0xf2), region = 62 }
  0x3f   : > { %s304_s5 = sand.u32 1, %s944_s18   ;;  %p346_p3 = scmp.lt.s32.totalorder %s956_s21, 1  ;;  %vm358_vm0 = vcmask 261120   ;;  %vm382_vm1 = vcmask 64512  }
  0x40   : > { %s700_s13 = smul.u32 96, %s304_s5  ;;  %s1255_s0 = sld [smem:[#allocation15_spill]] }
  0x41   : > { %s347_s14 = scalar_select %p346_p3, %s956_s21, 1 }
  0x42   : > { %s306_s29 = scalar_lea.vmem [#allocation2], %s700_s13  ;;  %s690_s18 = sshll.u32 %s956_s21, 2 }
  0x43   : > { %v685_v12 = vld [vmem:[%s306_s29 + $0x58] sm:$0xff]  ;;  %v684_v13 = vld [vmem:[%s306_s29 + $0x50] sm:$0xff]  ;;  %s675_s30 = sshll.u32 %s347_s14, 3  ;;  %v683_v16 = vld [vmem:[%s306_s29 + $0x48] sm:$0xff]  ;;  %s1238_s5 = sand.u32 1, %s936_s16  }
  0x44   : > { %427 = vmatpush.msra.mxu2 %v685_v12  ;;  %v680_v14 = vld [vmem:[%s306_s29 + $0x38] sm:$0xff]  ;;  %v679_v17 = vld [vmem:[%s306_s29 + $0x30] sm:$0xff]  ;;  %v678_v19 = vld [vmem:[%s306_s29 + $0x28] sm:$0xff]  ;;  %s458_s13 = sadd.s32 %s952_s20, %s690_s18  ;;  %s1110_s14 = sshll.u32 %s1238_s5, 3 }
  0x45   : > { %v357_v15 = vld [vmem:[%s306_s29 + $0x18] sm:$0xff]  ;;  %401 = vmatpush.msra.mxu1 %v680_v14  ;;  %v356_v18 = vld [vmem:[%s306_s29 + $0x10] sm:$0xff]  ;;  %v355_v20 = vld [vmem:[%s306_s29 + $0x8] sm:$0xff]  ;;  %s1114_s8 = sand.u32 1, %s665_s25   ;;  %s338_s21 = scalar_lea.vmem [#allocation5], %s1110_s14 }
  0x46   : > { %374 = vmatpush.msra.mxu0 %v357_v15  ;;  %s352_s9 = scalar_lea.vmem %s1255_s0, %s675_s30  ;;  %428 = vmatpush.msra.mxu2 %v684_v13  ;;  %v682_v21 = vld [vmem:[%s306_s29 + $0x40] sm:$0xff]  ;;  %s691_s30 = sshll.u32 %s458_s13, 3 }
  0x47   : > { %402 = vmatpush.msra.mxu1 %v679_v17  ;;  %v353_v22 = vld [vmem:[%s352_s9] sm:$0xff]  ;;  %s477_s9 = scalar_lea.hbm %s1235_s3, %s691_s30  ;;  %s460_s1 = scalar_lea.hbm %s1234_s2, %s691_s30 }
  0x48   : > { %375 = vmatpush.msra.mxu0 %v356_v18  ;;  %429 = vmatpush.msra.mxu2 %v683_v16  ;;  %v677_v23 = vld [vmem:[%s306_s29 + $0x20] sm:$0xff]  ;;  %s1123_s20 = sshll.u32 %s338_s21, 4  ;;  %s1125_s18 = sshll.u32 %s477_s9, 4  ;;  %s480_s20 = int_to_ptr.vmem [resolvable:$true] %s1123_s20  ;;  %s482_s18 = int_to_ptr.hbm [resolvable:$true] %s1125_s18 }
  0x49   : > { %403 = vmatpush.msra.mxu1 %v678_v19  ;;  %v354_v24 = vld [vmem:[%s306_s29] sm:$0xff]  ;;  %s331_s13 = scalar_lea.vmem [#allocation3], %s1110_s14  ;;  %s1130_s6 = sshll.u32 %s460_s1, 4 }
  0x4a   : > { %376 = vmatpush.msra.mxu0 %v355_v20  ;;  %430 = vmatpush.msra.mxu2 %v682_v21  ;;  %s1128_s25 = sshll.u32 %s331_s13, 4  ;;  %1257 = sst [smem:[#allocation14_spill]] %s1130_s6 }
  0x4b   : > { %686 = vmatmul.msk.f32.vlgmr.msra.gmra.mxu2 %vm358_vm0, %v353_v22  ;;  %404 = vmatpush.msra.mxu1 %v677_v23  ;;  %1256 = sst [smem:[#allocation13_spill]] %s1128_s25  ;;  %s494_s29 = scalar_lea.hbm %s1236_s4, %s691_s30 }
  0x4c   : > { %377 = vmatpush.msra.mxu0 %v354_v24  ;;  %681 = vmatmul.msk.f32.vlgmr.msra.gmra.mxu1 %vm358_vm0, %v353_v22  ;;  %s1244_s9 = scalar_lea.vmem [#allocation7], %s1110_s14  ;;  %s1145_s1 = sshll.u32 %s494_s29, 4  ;;  %s499_s1 = int_to_ptr.hbm [resolvable:$true] %s1145_s1 }
  0x4d   : > { %676 = vmatmul.msk.f32.vlgmr.msra.gmra.mxu0 %vm358_vm0, %v353_v22  ;;  %s1143_s5 = sshll.u32 %s1244_s9, 4  ;;  %s442_s28 = scalar_lea.sflag [#allocation6], %s1114_s8  ;;  %s497_s5 = int_to_ptr.vmem [resolvable:$true] %s1143_s5 }
  0x4e   : > { %s812_s27 = sshra.s32 %s482_s18, 4  ;;  %s813_s27 = int_to_ptr.hbm [resolvable:$true] %s812_s27 }
  0x4f   : > { %s814_s30 = scalar_lea.hbm %s813_s27, 8  ;;  %p819_p7 = scmp.lt.s32.totalorder %s813_s27, %s1235_s3 }
  0x50   : > { %p815_p4 = scmp.ne.s32.totalorder %s813_s27, %s814_s30 }
  0x52   : > { %p816_p5 = pnand %p815_p4, %p1076_p10 }
  0x54   : > { %p817_p6 = pneg %p816_p5 }
  0xc9   : > { %v406_v25 = vpop.f32.mrf.mxu1 }
  0xca   : > { %409 = vst.msk [vmem:[%s338_s21] sm:$0xff] %vm382_vm1, %v406_v25  ;;  %v379_v26 = vpop.f32.mrf.mxu0  ;;  %s818_s21 = scalar_lea.hbm %s1235_s3, 64 }
  0xcb   : > { %383 = vst.msk [vmem:[%s331_s13] sm:$0xff] %vm382_vm1, %v379_v26  ;;  %p820_p8 = scmp.lt.s32.totalorder %s818_s21, %s814_s30 }
  0xcd   : > { %p821_p9 = por %p820_p8, %p819_p7 }
  0xcf   : > { %p822_p11 = pnand %p821_p9, %p817_p6 }
  0xd1   : > { %825 = shalt.err (!%p822_p11)
}
  0xd2   : > { %s1258_s13 = sld [smem:[#allocation14_spill]]  ;;  %s1259_s29 = sand.u32 1, %s936_s16  }
  0xd3   : > { %702 = dma.vmem_to_hbm [thread:$0]  (%p1076_p10), %s480_s20, 128, %s482_s18, %s442_s28  }
  0xd4   : > { %s437_s9 = scalar_lea.sflag [#allocation4], %s1259_s29  ;;  %s846_s6 = scalar_lea.hbm %s1234_s2, 64 }
  0xd8   : > { %s1260_s0 = int_to_ptr.hbm [resolvable:$true] %s1258_s13 }
  0xd9   : > { %s840_s26 = sshra.s32 %s1260_s0, 4  ;;  %s841_s26 = int_to_ptr.hbm [resolvable:$true] %s840_s26 }
  0xda   : > { %s842_s23 = scalar_lea.hbm %s841_s26, 8  ;;  %p847_p2 = scmp.lt.s32.totalorder %s841_s26, %s1234_s2 }
  0xdb   : > { %p843_p13 = scmp.ne.s32.totalorder %s841_s26, %s842_s23  ;;  %p848_p3 = scmp.lt.s32.totalorder %s846_s6, %s842_s23 }
  0xdd   : > { %p844_p0 = pnand %p843_p13, %p1076_p10  ;;  %p849_p4 = por %p848_p3, %p847_p2 }
  0xdf   : > { %p845_p1 = pneg %p844_p0 }
  0xe1   : > { %p850_p5 = pnand %p849_p4, %p845_p1 }
  0xe3   : > { %853 = shalt.err (!%p850_p5)
}
  0xe4   : > { %s1261_s20 = smov %s1260_s0  ;;  %s1262_s18 = sld [smem:[#allocation13_spill]]  ;;  %v432_v27 = vpop.f32.mrf.mxu2 }
  0xe5   : > { %s1264_s0 = scalar_lea.vmem [#allocation7], %s1110_s14  ;;  %s868_s23 = sshra.s32 %s499_s1, 4  ;;  %s869_s23 = int_to_ptr.hbm [resolvable:$true] %s868_s23 }
  0xe6   : > { %435 = vst.msk [vmem:[%s1264_s0] sm:$0xff] %vm382_vm1, %v432_v27  ;;  %s870_s26 = scalar_lea.hbm %s869_s23, 8  ;;  %s874_s25 = scalar_lea.hbm %s1236_s4, 64 }
  0xe7   : > { %p871_p6 = scmp.ne.s32.totalorder %s869_s23, %s870_s26  ;;  %p875_p9 = scmp.lt.s32.totalorder %s869_s23, %s1236_s4 }
  0xe8   : > { %p876_p11 = scmp.lt.s32.totalorder %s874_s25, %s870_s26 }
  0xe9   : > { %p872_p7 = pnand %p871_p6, %p1076_p10 }
  0xea   : > { %s1263_s29 = int_to_ptr.vmem [resolvable:$true] %s1262_s18  ;;  %p877_p13 = por %p876_p11, %p875_p9 }
  0xeb   : > { %701 = dma.vmem_to_hbm [thread:$0]  (%p1076_p10), %s1263_s29, 128, %s1261_s20, %s437_s9  }
  0xec   : > { %p873_p8 = pneg %p872_p7 }
  0xee   : > { %p878_p0 = pnand %p877_p13, %p873_p8 }
  0xf0   : > { %881 = shalt.err (!%p878_p0)
}
  0xf1   : > { %703 = dma.vmem_to_hbm [thread:$0]  (%p1076_p10), %s497_s5, 128, %s499_s1, %s442_s28  }
  0xf2 PF: > { %p717_p1 = scmp.ge.s32.totalorder %s968_s24, 2  ;;  %s510_s14 = sand.u32 1, %s932_s15  }
  0xf3   : > { %s511_s9 = scalar_lea.sflag [#allocation4], %s510_s14 }
  0xf4   : > { %p708_p2 = pnand %p717_p1, %p1085_p12 }
  0xf6   : > { %p709_p3 = pneg %p708_p2 }
  0xf8   : > { %923 = dma.done.wait (%p709_p3), %s511_s9, 128  }
  0xf9   : > { %925 = vsyncadd (%p709_p3), %s511_s9, 4294967168  ;;  %s1265_s21 = sadd.s32 4294967294, %s968_s24  }
  0xfa   : > { %s520_s20 = sand.u32 1, %s1265_s21  }
  0xfb   : > { %s521_s18 = scalar_lea.sflag [#allocation6], %s520_s20 }
  0xfc   : > { %927 = dma.done.wait (%p709_p3), %s521_s18, 256  }
  0xfd   : > { %929 = vsyncadd (%p709_p3), %s521_s18, 4294967040  ;;  %s21_s24 = sadd.s32 1, %s968_s24   ;;  %s1266_s21 = sld [smem:[#allocation10_spill]] }
  0xfe   : > { %p18_p10 = scmp.ge.s32.totalorder %s21_s24, 10   ;;  %s1267_s28 = sld [smem:[#allocation11_spill]] }
  0xff   : > { %s1268_s23 = sld [smem:[#allocation12_spill]]  ;;  %s1269_s15 = smov %s936_s16 }
 0x100   : > { %s1270_s16 = smov %s940_s17  ;;  %s1271_s17 = smov %s1083_s11 }
 0x101   : > { %s1272_s18 = smov %s948_s19  ;;  %s1273_s19 = smov %s1068_s7 }
 0x102   : > { %s1274_s20 = smov %s960_s22  ;;  %20 = sbr.rel (!%p18_p10) target bundleno = 11 (0xb), region = 143 }
 0x104   : > { %s1275_s22 = smov %s1267_s28 }
 0x107   :  { %537 = vsyncpa [#allocation4], 1 }
 0x108   :  { %539 = vsyncpa [#allocation4 + $0x1], 1 }
 0x109   :  { %540 = vsyncpa [#allocation6], 1 }
 0x10a   :  { %542 = vsyncpa [#allocation6 + $0x1], 1 }

</bundles_post_ra>
